<compile_context>
chip_gen: v6e
topology: v6e:2x2x1
jax: 0.10.0
libtpu: 0.0.40
codegen_flags: <defaults>
</compile_context>

<pallas_src>
import jax
import jax.numpy as jnp
from jax.experimental import pallas as pl
from jax.experimental.pallas import tpu as pltpu


_LANE = 128          # TPU lane width: output/input minor tile dims stay 128-multiples
_MAX_TN = 8          # max batch elements per block (bounds kernel unroll)
_BLOCK_BYTES = 1 << 20   # ~1 MiB of payload per grid step


# ---------------------------------------------------------------------------
# Kernel: block (tn, ta, tb) -> (tn, tb, ta).  tn is static; unroll per-slice
# 2-D transposes (XLU work, hidden under DMA in this mem-bound kernel).
# ---------------------------------------------------------------------------

def _btranspose_kernel(x_ref, o_ref):
    for n in range(x_ref.shape[0]):            # static trip count (= tn)
        o_ref[n, :, :] = x_ref[n, :, :].T      # 2-D transpose per slice


# ---------------------------------------------------------------------------
# Tile selection: 128-multiple tiles, ~1 MiB per block (dtype-aware), batch
# several tiles per step when tiles are small.
# ---------------------------------------------------------------------------

def _round_down_lane(x):
    return (x // _LANE) * _LANE


def _pick_tiles(nb, a, b, itemsize):
    # Element budget per block (~1 MiB of payload, never below one 128x128 tile).
    budget = max(_BLOCK_BYTES // itemsize, _LANE * _LANE)

    ta = min(_round_down_lane(a), 1024)
    tb = min(_round_down_lane(b), 1024)
    # Shrink (staying a multiple of 128) until the block fits the budget.
    while ta * tb > budget:
        if ta >= tb and ta > _LANE:
            ta = max(_LANE, _round_down_lane(ta // 2))
        elif tb > _LANE:
            tb = max(_LANE, _round_down_lane(tb // 2))
        else:
            break

    # Batch multiple (ta, tb) tiles per grid step to amortize the ~0.35 us
    # fixed per-step overhead when a single tile is small.
    tn = max(1, min(nb, budget // (ta * tb), _MAX_TN))
    return tn, ta, tb


# ---------------------------------------------------------------------------
# Tiled batched 2-D transpose:  (Nb, A, B) -> (Nb, B, A), A >= 128, B >= 128.
# ---------------------------------------------------------------------------

def _batched_transpose_2d(x3):
    nb, a, b = x3.shape
    itemsize = jnp.dtype(x3.dtype).itemsize
    tn, ta, tb = _pick_tiles(nb, a, b, itemsize)
    grid = (pl.cdiv(nb, tn), pl.cdiv(a, ta), pl.cdiv(b, tb))
    block_bytes = tn * ta * tb * itemsize

    return pl.pallas_call(
        _btranspose_kernel,
        out_shape=jax.ShapeDtypeStruct((nb, b, a), x3.dtype),
        grid_spec=pltpu.PrefetchScalarGridSpec(
            num_scalar_prefetch=0,
            grid=grid,
            in_specs=[
                pl.BlockSpec((tn, ta, tb), lambda n, i, j: (n, i, j)),
            ],
            out_specs=pl.BlockSpec((tn, tb, ta), lambda n, i, j: (n, j, i)),
        ),
        compiler_params=pltpu.CompilerParams(
            # Every grid point writes a distinct output tile -> no carried
            # state; three parallel axes let the v7x megacore shard the work.
            dimension_semantics=("parallel", "parallel", "parallel"),
            # Blocks are capped at ~1 MiB, so double-buffered in+out stays
            # well inside every generation's scoped VMEM; set the limit
            # explicitly anyway.
            vmem_limit_bytes=int(max(16 << 20, 8 * block_bytes)),
        ),
        cost_estimate=pl.CostEstimate(
            flops=0,
            transcendentals=0,
            bytes_accessed=2 * nb * a * b * itemsize,
        ),
    )(x3)


# ---------------------------------------------------------------------------
# Axis plumbing: drop size-1 dims, then merge input dims that stay adjacent
# and in-order under the permutation (both are free reshapes).
# ---------------------------------------------------------------------------

def _squeeze_unit_dims(shape, perm):
    keep = [d for d in range(len(shape)) if shape[d] != 1]
    remap = {d: i for i, d in enumerate(keep)}
    new_shape = tuple(shape[d] for d in keep)
    new_perm = tuple(remap[p] for p in perm if shape[p] != 1)
    return new_shape, new_perm


def _coalesce(shape, perm):
    """Return (coalesced_shape, coalesced_perm)."""
    groups = []  # runs of consecutive input dims, listed in *output* order
    for p in perm:
        if groups and p == groups[-1][-1] + 1:
            groups[-1].append(p)
        else:
            groups.append([p])
    order = sorted(range(len(groups)), key=lambda g: groups[g][0])
    c_shape = []
    pos_of_group = {}
    for new_axis, g in enumerate(order):
        size = 1
        for d in groups[g]:
            size *= shape[d]
        c_shape.append(size)
        pos_of_group[g] = new_axis
    c_perm = tuple(pos_of_group[g] for g in range(len(groups)))
    return tuple(c_shape), c_perm


# ---------------------------------------------------------------------------
# Public wrapper: equivalent of Permute(*perm)(x) == torch.permute(x, perm)
# ---------------------------------------------------------------------------

def permute(x, perm):
    ndim = x.ndim
    perm = tuple(int(p) % ndim for p in perm)
    assert sorted(perm) == list(range(ndim)), "invalid permutation"
    out_shape = tuple(x.shape[p] for p in perm)

    s_shape, s_perm = _squeeze_unit_dims(x.shape, perm)
    c_shape, c_perm = _coalesce(s_shape, s_perm)

    if c_perm == tuple(range(len(c_perm))):
        # Only size-1 dims move (or identity): pure reshape, no data movement.
        return jnp.reshape(x, out_shape)

    if c_perm == (1, 0):
        # Pure 2-D transpose: unit batch dim, reuse the batched kernel.
        a, b = c_shape
        if min(a, b) >= _LANE:
            y = _batched_transpose_2d(jnp.reshape(x, (1, a, b)))
            return jnp.reshape(y, out_shape)

    if c_perm == (0, 2, 1):
        # Batched 2-D transpose. Covers Permute(0,2,3,1) and Permute(0,3,1,2).
        nb, a, b = c_shape
        if min(a, b) >= _LANE:
            y = _batched_transpose_2d(jnp.reshape(x, (nb, a, b)))
            return jnp.reshape(y, out_shape)

    # TODO(synk): permutations that don't coalesce to a (batched) 2-D
    # transpose, and shapes whose transposed dims are < 128 (masked-store /
    # overhead-dominated on TPU), fall back to XLA's transpose.
    return jnp.transpose(x, perm)


class Permute:
    """JAX/Pallas equivalent of the PyTorch Permute(nn.Module) wrapper."""

    def __init__(self, *args):
        self.args = args

    def __call__(self, x):
        return permute(x, self.args)


if __name__ == "__main__":
    key = jax.random.PRNGKey(0)
    k1, k2, k3, k4, k5 = jax.random.split(key, 5)

    # 1) Canonical ConvNeXt use: Permute(0,2,3,1), NCHW -> NHWC (kernel path,
    #    coalesces to (2, 128, 256), batched-in-block tiles).
    x1 = jax.random.normal(k1, (2, 128, 16, 16), dtype=jnp.float32)
    out1 = jax.block_until_ready(Permute(0, 2, 3, 1)(x1))
    ref1 = jnp.transpose(x1, (0, 2, 3, 1))
    assert out1.shape == ref1.shape and out1.dtype == ref1.dtype
    assert jnp.array_equal(out1, ref1), "Permute(0,2,3,1) mismatch"

    # 2) Inverse use: Permute(0,3,1,2), NHWC -> NCHW (kernel path).
    x2 = jax.random.normal(k2, (2, 16, 16, 128), dtype=jnp.float32)
    out2 = jax.block_until_ready(Permute(0, 3, 1, 2)(x2))
    ref2 = jnp.transpose(x2, (0, 3, 1, 2))
    assert out2.shape == ref2.shape and out2.dtype == ref2.dtype
    assert jnp.array_equal(out2, ref2), "Permute(0,3,1,2) mismatch"

    # 3) Non-128-multiple dims (160 x 144): exercises the pl.cdiv grid with
    #    masked edge blocks (kernel path, nb squeezed to 1).
    x3 = jax.random.normal(k3, (1, 160, 12, 12), dtype=jnp.float32)
    out3 = jax.block_until_ready(permute(x3, (0, 2, 3, 1)))
    ref3 = jnp.transpose(x3, (0, 2, 3, 1))
    assert jnp.array_equal(out3, ref3), "cdiv/masked-edge permute mismatch"

    # 4) bf16: dtype-aware tile / batch-in-block selection (kernel path).
    x4 = jax.random.normal(k4, (2, 256, 8, 16), dtype=jnp.bfloat16)
    out4 = jax.block_until_ready(permute(x4, (0, 2, 3, 1)))
    ref4 = jnp.transpose(x4, (0, 2, 3, 1))
    assert jnp.array_equal(out4, ref4), "bf16 permute mismatch"

    # 5) Small, unaligned channels (C=4): dispatch falls back to XLA instead
    #    of emitting a masked-store kernel.
    x5 = jax.random.normal(k5, (2, 4, 16, 16), dtype=jnp.float32)
    out5 = jax.block_until_ready(permute(x5, (0, 2, 3, 1)))
    ref5 = jnp.transpose(x5, (0, 2, 3, 1))
    assert jnp.array_equal(out5, ref5), "small-shape permute mismatch"

    print("KERNEL_OK")
</pallas_src>

<mosaic_0001>
module attributes {stable_mosaic.version = 11 : i64} {
  func.func @_btranspose_kernel(%arg0: i32, %arg1: i32, %arg2: i32, %arg3: memref<2x128x256xf32, #tpu.memory_space<vmem>>, %arg4: memref<2x256x128xf32, #tpu.memory_space<vmem>>) attributes {dimension_semantics = [#tpu.dimension_semantics<parallel>, #tpu.dimension_semantics<parallel>, #tpu.dimension_semantics<parallel>], iteration_bounds = array<i64: 1, 1, 1>, scalar_prefetch = 0 : i64, scratch_operands = 0 : i64, tpu.core_type = #tpu.core_type<tc>, window_params = [{transform_indices = @transform_0, window_bounds = array<i64: 2, 128, 256>}, {transform_indices = @transform_1, window_bounds = array<i64: 2, 256, 128>}]} {
    %c0 = arith.constant 0 : index
    %c0_0 = arith.constant 0 : index
    %c0_1 = arith.constant 0 : index
    %0 = vector.load %arg3[%c0, %c0_0, %c0_1] : memref<2x128x256xf32, #tpu.memory_space<vmem>>, vector<1x128x256xf32>
    %1 = vector.shape_cast %0 : vector<1x128x256xf32> to vector<128x256xf32>
    %2 = tpu.transpose %1, [1, 0] : vector<128x256xf32> -> vector<256x128xf32>
    %c0_2 = arith.constant 0 : index
    %c0_3 = arith.constant 0 : index
    %c0_4 = arith.constant 0 : index
    %3 = vector.load %arg4[%c0_2, %c0_3, %c0_4] : memref<2x256x128xf32, #tpu.memory_space<vmem>>, vector<1x256x128xf32>
    %4 = vector.shape_cast %3 : vector<1x256x128xf32> to vector<256x128xf32>
    %5 = vector.shape_cast %2 : vector<256x128xf32> to vector<1x256x128xf32>
    tpu.vector_store %arg4[%c0_2, %c0_3, %c0_4], %5 {strides = array<i32>} : memref<2x256x128xf32, #tpu.memory_space<vmem>>, vector<1x256x128xf32>,
    %c1 = arith.constant 1 : index
    %c0_5 = arith.constant 0 : index
    %c0_6 = arith.constant 0 : index
    %6 = vector.load %arg3[%c1, %c0_5, %c0_6] : memref<2x128x256xf32, #tpu.memory_space<vmem>>, vector<1x128x256xf32>
    %7 = vector.shape_cast %6 : vector<1x128x256xf32> to vector<128x256xf32>
    %8 = tpu.transpose %7, [1, 0] : vector<128x256xf32> -> vector<256x128xf32>
    %c1_7 = arith.constant 1 : index
    %c0_8 = arith.constant 0 : index
    %c0_9 = arith.constant 0 : index
    %9 = vector.load %arg4[%c1_7, %c0_8, %c0_9] : memref<2x256x128xf32, #tpu.memory_space<vmem>>, vector<1x256x128xf32>
    %10 = vector.shape_cast %9 : vector<1x256x128xf32> to vector<256x128xf32>
    %11 = vector.shape_cast %8 : vector<256x128xf32> to vector<1x256x128xf32>
    tpu.vector_store %arg4[%c1_7, %c0_8, %c0_9], %11 {strides = array<i32>} : memref<2x256x128xf32, #tpu.memory_space<vmem>>, vector<1x256x128xf32>,
    return
  }
  func.func @transform_0(%arg0: i32, %arg1: i32, %arg2: i32) -> (i32, i32, i32) {
    %c0_i32 = arith.constant 0 : i32
    return %arg0, %arg1, %arg2 : i32, i32, i32
  }
  func.func @transform_1(%arg0: i32, %arg1: i32, %arg2: i32) -> (i32, i32, i32) {
    %c0_i32 = arith.constant 0 : i32
    return %arg0, %arg2, %arg1 : i32, i32, i32
  }
}

</mosaic_0001>

<bundles_post_ra>
// kernel: tpu_custom_call.1
= control target key start
LH: loop header
LB: loop body
LE: loop exit
PB: predicated region body
PF: predicated region fallthrough
CT: control target
= control target key end

     0   :  { %6 = vsyncpa [#allocation3], 0  ;;  %s370_s0 = inlined_call_operand.hbm [shape: f32[2,128,256], index: 0, kind: input, shape index: {}]   ;;  %s371_s1 = inlined_call_operand.hbm [shape: f32[2,256,128], index: 1, kind: output, shape index: {}]  }
   0x1   :  { %7 = vsyncpa [#allocation4], 0  ;;  %s348_s6 = smov [#allocation2]  }
   0x2   :  { %s13_s7 = sshll.u32 %s348_s6, 4  ;;  %s14_s7 = int_to_ptr.vmem [resolvable:$true] %s13_s7 }
   0x3   :  { %s312_s8 = scalar_lea.vmem %s14_s7, 8192  ;;  %p317_p1 = scmp.lt.s32.totalorder %s14_s7, %s14_s7 }
   0x4   :  { %p313_p0 = scmp.ne.s32.totalorder %s14_s7, %s312_s8  ;;  %p318_p2 = scmp.lt.s32.totalorder %s312_s8, %s312_s8 }
   0x6   :  { %p319_p3 = por %p318_p2, %p317_p1 }
   0x8   :  { %p320_p4 = pnand %p319_p3, %p313_p0 }
   0xa   :  { %323 = shalt.err (!%p320_p4)
}
   0xb   :  { %s349_s9 = smov 256   ;;  %s350_s10 = smov 16  }
   0xc   :  { %19 = dma.hbm_to_vmem [thread:$0]  %s370_s0, 8192, %s14_s7, [#allocation3], %s349_s9, %s349_s9, %s350_s10  }
   0xd   :  { %344 = dma.done.wait [#allocation3], 8192  }
   0xe   :  { %345 = vsyncadd [#allocation3], 4294959104  ;;  %v24_v0 = vld [vmem:[#allocation2 + $0x8] sm:$0xff]  ;;  %v23_v1 = vld [vmem:[#allocation2] sm:$0xff]  ;;  %s351_s0 = smov [#allocation5]  }
   0xf   :  { %87 = vxpose.xlu1.b32.start [1/16] %v24_v0, 128  ;;  %55 = vxpose.xlu0.b32.start [1/16] %v23_v1, 128  ;;  %v26_v2 = vld [vmem:[#allocation2 + $0x18] sm:$0xff]  ;;  %v25_v3 = vld [vmem:[#allocation2 + $0x10] sm:$0xff]  ;;  %v28_v4 = vld [vmem:[#allocation2 + $0x28] sm:$0xff]  ;;  %s286_s13 = sshll.u32 %s351_s0, 4  ;;  %s287_s13 = int_to_ptr.vmem [resolvable:$true] %s286_s13 }
  0x10   :  { %v27_v5 = vld [vmem:[#allocation2 + $0x20] sm:$0xff]  ;;  %v30_v6 = vld [vmem:[#allocation2 + $0x38] sm:$0xff]  ;;  %v29_v7 = vld [vmem:[#allocation2 + $0x30] sm:$0xff]  ;;  %s324_s14 = scalar_lea.vmem %s287_s13, 8192  ;;  %p329_p6 = scmp.lt.s32.totalorder %s287_s13, %s287_s13 }
  0x11   :  { %v32_v8 = vld [vmem:[#allocation2 + $0x48] sm:$0xff]  ;;  %v31_v9 = vld [vmem:[#allocation2 + $0x40] sm:$0xff]  ;;  %v34_v10 = vld [vmem:[#allocation2 + $0x58] sm:$0xff]  ;;  %p325_p5 = scmp.ne.s32.totalorder %s287_s13, %s324_s14  ;;  %p330_p7 = scmp.lt.s32.totalorder %s324_s14, %s324_s14 }
  0x12   :  { %v33_v11 = vld [vmem:[#allocation2 + $0x50] sm:$0xff]  ;;  %v36_v12 = vld [vmem:[#allocation2 + $0x68] sm:$0xff]  ;;  %v35_v13 = vld [vmem:[#allocation2 + $0x60] sm:$0xff] }
  0x13   :  { %88 = vxpose.xlu1.b32.cont [2/16] %v26_v2, 128  ;;  %56 = vxpose.xlu0.b32.cont [2/16] %v25_v3, 128  ;;  %v38_v14 = vld [vmem:[#allocation2 + $0x78] sm:$0xff]  ;;  %v37_v15 = vld [vmem:[#allocation2 + $0x70] sm:$0xff]  ;;  %v40_v16 = vld [vmem:[#allocation2 + $0x88] sm:$0xff]  ;;  %p331_p8 = por %p330_p7, %p329_p6 }
  0x14   :  { %v39_v17 = vld [vmem:[#allocation2 + $0x80] sm:$0xff]  ;;  %v42_v18 = vld [vmem:[#allocation2 + $0x98] sm:$0xff]  ;;  %v41_v19 = vld [vmem:[#allocation2 + $0x90] sm:$0xff] }
  0x15   :  { %v44_v20 = vld [vmem:[#allocation2 + $0xa8] sm:$0xff]  ;;  %v43_v21 = vld [vmem:[#allocation2 + $0xa0] sm:$0xff]  ;;  %v46_v22 = vld [vmem:[#allocation2 + $0xb8] sm:$0xff]  ;;  %p332_p9 = pnand %p331_p8, %p325_p5 }
  0x16   :  { %v45_v23 = vld [vmem:[#allocation2 + $0xb0] sm:$0xff]  ;;  %v48_v24 = vld [vmem:[#allocation2 + $0xc8] sm:$0xff]  ;;  %v47_v25 = vld [vmem:[#allocation2 + $0xc0] sm:$0xff] }
  0x17   :  { %89 = vxpose.xlu1.b32.cont [3/16] %v28_v4, 128  ;;  %57 = vxpose.xlu0.b32.cont [3/16] %v27_v5, 128  ;;  %v50_v26 = vld [vmem:[#allocation2 + $0xd8] sm:$0xff]  ;;  %v49_v27 = vld [vmem:[#allocation2 + $0xd0] sm:$0xff]  ;;  %v52_v28 = vld [vmem:[#allocation2 + $0xe8] sm:$0xff] }
  0x18   :  { %v51_v29 = vld [vmem:[#allocation2 + $0xe0] sm:$0xff]  ;;  %v54_v30 = vld [vmem:[#allocation2 + $0xf8] sm:$0xff]  ;;  %v53_v31 = vld [vmem:[#allocation2 + $0xf0] sm:$0xff] }
  0x19   :  { %v153_v32 = vld [vmem:[#allocation2 + $0x108] sm:$0xff]  ;;  %v152_v33 = vld [vmem:[#allocation2 + $0x100] sm:$0xff]  ;;  %v155_v34 = vld [vmem:[#allocation2 + $0x118] sm:$0xff] }
  0x1a   :  { %v154_v35 = vld [vmem:[#allocation2 + $0x110] sm:$0xff]  ;;  %v157_v36 = vld [vmem:[#allocation2 + $0x128] sm:$0xff]  ;;  %v156_v37 = vld [vmem:[#allocation2 + $0x120] sm:$0xff] }
  0x1b   :  { %90 = vxpose.xlu1.b32.cont [4/16] %v30_v6, 128  ;;  %58 = vxpose.xlu0.b32.cont [4/16] %v29_v7, 128  ;;  %v159_v38 = vld [vmem:[#allocation2 + $0x138] sm:$0xff]  ;;  %v158_v39 = vld [vmem:[#allocation2 + $0x130] sm:$0xff]  ;;  %v161_v40 = vld [vmem:[#allocation2 + $0x148] sm:$0xff] }
  0x1c   :  { %v160_v41 = vld [vmem:[#allocation2 + $0x140] sm:$0xff]  ;;  %v163_v42 = vld [vmem:[#allocation2 + $0x158] sm:$0xff]  ;;  %v162_v43 = vld [vmem:[#allocation2 + $0x150] sm:$0xff] }
  0x1d   :  { %v165_v44 = vld [vmem:[#allocation2 + $0x168] sm:$0xff]  ;;  %v164_v45 = vld [vmem:[#allocation2 + $0x160] sm:$0xff]  ;;  %v167_v46 = vld [vmem:[#allocation2 + $0x178] sm:$0xff] }
  0x1e   :  { %v166_v47 = vld [vmem:[#allocation2 + $0x170] sm:$0xff]  ;;  %v169_v48 = vld [vmem:[#allocation2 + $0x188] sm:$0xff]  ;;  %v168_v49 = vld [vmem:[#allocation2 + $0x180] sm:$0xff] }
  0x1f   :  { %91 = vxpose.xlu1.b32.cont [5/16] %v32_v8, 128  ;;  %59 = vxpose.xlu0.b32.cont [5/16] %v31_v9, 128  ;;  %v171_v50 = vld [vmem:[#allocation2 + $0x198] sm:$0xff]  ;;  %v170_v51 = vld [vmem:[#allocation2 + $0x190] sm:$0xff]  ;;  %v173_v52 = vld [vmem:[#allocation2 + $0x1a8] sm:$0xff] }
  0x20   :  { %v172_v53 = vld [vmem:[#allocation2 + $0x1a0] sm:$0xff]  ;;  %v175_v54 = vld [vmem:[#allocation2 + $0x1b8] sm:$0xff]  ;;  %v174_v55 = vld [vmem:[#allocation2 + $0x1b0] sm:$0xff] }
  0x21   :  { %v177_v56 = vld [vmem:[#allocation2 + $0x1c8] sm:$0xff]  ;;  %v176_v57 = vld [vmem:[#allocation2 + $0x1c0] sm:$0xff]  ;;  %v179_v58 = vld [vmem:[#allocation2 + $0x1d8] sm:$0xff] }
  0x22   :  { %v178_v59 = vld [vmem:[#allocation2 + $0x1d0] sm:$0xff]  ;;  %v181_v60 = vld [vmem:[#allocation2 + $0x1e8] sm:$0xff]  ;;  %v180_v61 = vld [vmem:[#allocation2 + $0x1e0] sm:$0xff] }
  0x23   :  { %92 = vxpose.xlu1.b32.cont [6/16] %v34_v10, 128  ;;  %60 = vxpose.xlu0.b32.cont [6/16] %v33_v11, 128  ;;  %v183_v62 = vld [vmem:[#allocation2 + $0x1f8] sm:$0xff]  ;;  %v182_v63 = vld [vmem:[#allocation2 + $0x1f0] sm:$0xff] }
  0x27   :  { %93 = vxpose.xlu1.b32.cont [7/16] %v36_v12, 128  ;;  %61 = vxpose.xlu0.b32.cont [7/16] %v35_v13, 128 }
  0x2b   :  { %94 = vxpose.xlu1.b32.cont [8/16] %v38_v14, 128  ;;  %62 = vxpose.xlu0.b32.cont [8/16] %v37_v15, 128 }
  0x2f   :  { %95 = vxpose.xlu1.b32.cont [9/16] %v40_v16, 128  ;;  %63 = vxpose.xlu0.b32.cont [9/16] %v39_v17, 128 }
  0x33   :  { %96 = vxpose.xlu1.b32.cont [10/16] %v42_v18, 128  ;;  %64 = vxpose.xlu0.b32.cont [10/16] %v41_v19, 128 }
  0x37   :  { %97 = vxpose.xlu1.b32.cont [11/16] %v44_v20, 128  ;;  %65 = vxpose.xlu0.b32.cont [11/16] %v43_v21, 128 }
  0x3b   :  { %98 = vxpose.xlu1.b32.cont [12/16] %v46_v22, 128  ;;  %66 = vxpose.xlu0.b32.cont [12/16] %v45_v23, 128 }
  0x3f   :  { %99 = vxpose.xlu1.b32.cont [13/16] %v48_v24, 128  ;;  %67 = vxpose.xlu0.b32.cont [13/16] %v47_v25, 128 }
  0x43   :  { %100 = vxpose.xlu1.b32.cont [14/16] %v50_v26, 128  ;;  %68 = vxpose.xlu0.b32.cont [14/16] %v49_v27, 128 }
  0x47   :  { %101 = vxpose.xlu1.b32.cont [15/16] %v52_v28, 128  ;;  %69 = vxpose.xlu0.b32.cont [15/16] %v51_v29, 128 }
  0x4b   :  { %102 = vxpose.xlu1.b32.end [16/16] %v54_v30, 128  ;;  %70 = vxpose.xlu0.b32.end [16/16] %v53_v31, 128 }
  0x4f   :  { %216 = vxpose.xlu1.b32.start [1/16] %v153_v32, 128  ;;  %184 = vxpose.xlu0.b32.start [1/16] %v152_v33, 128 }
  0x53   :  { %217 = vxpose.xlu1.b32.cont [2/16] %v155_v34, 128  ;;  %185 = vxpose.xlu0.b32.cont [2/16] %v154_v35, 128 }
  0x57   :  { %218 = vxpose.xlu1.b32.cont [3/16] %v157_v36, 128  ;;  %186 = vxpose.xlu0.b32.cont [3/16] %v156_v37, 128 }
  0x5b   :  { %219 = vxpose.xlu1.b32.cont [4/16] %v159_v38, 128  ;;  %187 = vxpose.xlu0.b32.cont [4/16] %v158_v39, 128 }
  0x5f   :  { %220 = vxpose.xlu1.b32.cont [5/16] %v161_v40, 128  ;;  %188 = vxpose.xlu0.b32.cont [5/16] %v160_v41, 128 }
  0x63   :  { %221 = vxpose.xlu1.b32.cont [6/16] %v163_v42, 128  ;;  %189 = vxpose.xlu0.b32.cont [6/16] %v162_v43, 128 }
  0x67   :  { %222 = vxpose.xlu1.b32.cont [7/16] %v165_v44, 128  ;;  %190 = vxpose.xlu0.b32.cont [7/16] %v164_v45, 128 }
  0x6b   :  { %223 = vxpose.xlu1.b32.cont [8/16] %v167_v46, 128  ;;  %191 = vxpose.xlu0.b32.cont [8/16] %v166_v47, 128 }
  0x6f   :  { %224 = vxpose.xlu1.b32.cont [9/16] %v169_v48, 128  ;;  %192 = vxpose.xlu0.b32.cont [9/16] %v168_v49, 128 }
  0x73   :  { %225 = vxpose.xlu1.b32.cont [10/16] %v171_v50, 128  ;;  %193 = vxpose.xlu0.b32.cont [10/16] %v170_v51, 128 }
  0x77   :  { %226 = vxpose.xlu1.b32.cont [11/16] %v173_v52, 128  ;;  %194 = vxpose.xlu0.b32.cont [11/16] %v172_v53, 128 }
  0x7b   :  { %227 = vxpose.xlu1.b32.cont [12/16] %v175_v54, 128  ;;  %195 = vxpose.xlu0.b32.cont [12/16] %v174_v55, 128 }
  0x7f   :  { %228 = vxpose.xlu1.b32.cont [13/16] %v177_v56, 128  ;;  %196 = vxpose.xlu0.b32.cont [13/16] %v176_v57, 128 }
  0x83   :  { %229 = vxpose.xlu1.b32.cont [14/16] %v179_v58, 128  ;;  %197 = vxpose.xlu0.b32.cont [14/16] %v178_v59, 128 }
  0x87   :  { %230 = vxpose.xlu1.b32.cont [15/16] %v181_v60, 128  ;;  %198 = vxpose.xlu0.b32.cont [15/16] %v180_v61, 128 }
  0x8b   :  { %231 = vxpose.xlu1.b32.end [16/16] %v183_v62, 128  ;;  %v103_v0 = vpop.trf.xlu1  ;;  %199 = vxpose.xlu0.b32.end [16/16] %v182_v63, 128  ;;  %v71_v1 = vpop.trf.xlu0 }
  0x8c   :  { %135 = vst [vmem:[#allocation5 + $0x80] sm:$0xff] %v103_v0  ;;  %119 = vst [vmem:[#allocation5] sm:$0xff] %v71_v1 }
  0x8f   :  { %v104_v2 = vpop.trf.xlu1  ;;  %v72_v3 = vpop.trf.xlu0 }
  0x90   :  { %136 = vst [vmem:[#allocation5 + $0x88] sm:$0xff] %v104_v2  ;;  %120 = vst [vmem:[#allocation5 + $0x8] sm:$0xff] %v72_v3 }
  0x93   :  { %v105_v4 = vpop.trf.xlu1  ;;  %v73_v5 = vpop.trf.xlu0 }
  0x94   :  { %137 = vst [vmem:[#allocation5 + $0x90] sm:$0xff] %v105_v4  ;;  %121 = vst [vmem:[#allocation5 + $0x10] sm:$0xff] %v73_v5 }
  0x97   :  { %v106_v6 = vpop.trf.xlu1  ;;  %v74_v7 = vpop.trf.xlu0 }
  0x98   :  { %138 = vst [vmem:[#allocation5 + $0x98] sm:$0xff] %v106_v6  ;;  %122 = vst [vmem:[#allocation5 + $0x18] sm:$0xff] %v74_v7 }
  0x9b   :  { %v107_v8 = vpop.trf.xlu1  ;;  %v75_v9 = vpop.trf.xlu0 }
  0x9c   :  { %139 = vst [vmem:[#allocation5 + $0xa0] sm:$0xff] %v107_v8  ;;  %123 = vst [vmem:[#allocation5 + $0x20] sm:$0xff] %v75_v9 }
  0x9f   :  { %v108_v10 = vpop.trf.xlu1  ;;  %v76_v11 = vpop.trf.xlu0 }
  0xa0   :  { %140 = vst [vmem:[#allocation5 + $0xa8] sm:$0xff] %v108_v10  ;;  %124 = vst [vmem:[#allocation5 + $0x28] sm:$0xff] %v76_v11 }
  0xa3   :  { %v109_v12 = vpop.trf.xlu1  ;;  %v77_v13 = vpop.trf.xlu0 }
  0xa4   :  { %141 = vst [vmem:[#allocation5 + $0xb0] sm:$0xff] %v109_v12  ;;  %125 = vst [vmem:[#allocation5 + $0x30] sm:$0xff] %v77_v13 }
  0xa7   :  { %v110_v14 = vpop.trf.xlu1  ;;  %v78_v15 = vpop.trf.xlu0 }
  0xa8   :  { %142 = vst [vmem:[#allocation5 + $0xb8] sm:$0xff] %v110_v14  ;;  %126 = vst [vmem:[#allocation5 + $0x38] sm:$0xff] %v78_v15 }
  0xab   :  { %v111_v16 = vpop.trf.xlu1  ;;  %v79_v17 = vpop.trf.xlu0 }
  0xac   :  { %143 = vst [vmem:[#allocation5 + $0xc0] sm:$0xff] %v111_v16  ;;  %127 = vst [vmem:[#allocation5 + $0x40] sm:$0xff] %v79_v17 }
  0xaf   :  { %v112_v18 = vpop.trf.xlu1  ;;  %v80_v19 = vpop.trf.xlu0 }
  0xb0   :  { %144 = vst [vmem:[#allocation5 + $0xc8] sm:$0xff] %v112_v18  ;;  %128 = vst [vmem:[#allocation5 + $0x48] sm:$0xff] %v80_v19 }
  0xb3   :  { %v113_v20 = vpop.trf.xlu1  ;;  %v81_v21 = vpop.trf.xlu0 }
  0xb4   :  { %145 = vst [vmem:[#allocation5 + $0xd0] sm:$0xff] %v113_v20  ;;  %129 = vst [vmem:[#allocation5 + $0x50] sm:$0xff] %v81_v21 }
  0xb7   :  { %v114_v22 = vpop.trf.xlu1  ;;  %v82_v23 = vpop.trf.xlu0 }
  0xb8   :  { %146 = vst [vmem:[#allocation5 + $0xd8] sm:$0xff] %v114_v22  ;;  %130 = vst [vmem:[#allocation5 + $0x58] sm:$0xff] %v82_v23 }
  0xbb   :  { %v115_v24 = vpop.trf.xlu1  ;;  %v83_v25 = vpop.trf.xlu0 }
  0xbc   :  { %147 = vst [vmem:[#allocation5 + $0xe0] sm:$0xff] %v115_v24  ;;  %131 = vst [vmem:[#allocation5 + $0x60] sm:$0xff] %v83_v25 }
  0xbf   :  { %v116_v26 = vpop.trf.xlu1  ;;  %v84_v27 = vpop.trf.xlu0 }
  0xc0   :  { %148 = vst [vmem:[#allocation5 + $0xe8] sm:$0xff] %v116_v26  ;;  %132 = vst [vmem:[#allocation5 + $0x68] sm:$0xff] %v84_v27 }
  0xc3   :  { %v117_v28 = vpop.trf.xlu1  ;;  %v85_v29 = vpop.trf.xlu0 }
  0xc4   :  { %149 = vst [vmem:[#allocation5 + $0xf0] sm:$0xff] %v117_v28  ;;  %133 = vst [vmem:[#allocation5 + $0x70] sm:$0xff] %v85_v29 }
  0xc7   :  { %v118_v30 = vpop.trf.xlu1  ;;  %v86_v31 = vpop.trf.xlu0 }
  0xc8   :  { %150 = vst [vmem:[#allocation5 + $0xf8] sm:$0xff] %v118_v30  ;;  %134 = vst [vmem:[#allocation5 + $0x78] sm:$0xff] %v86_v31 }
  0xcb   :  { %v232_v32 = vpop.trf.xlu1  ;;  %v200_v33 = vpop.trf.xlu0 }
  0xcc   :  { %265 = vst [vmem:[#allocation5 + $0x180] sm:$0xff] %v232_v32  ;;  %249 = vst [vmem:[#allocation5 + $0x100] sm:$0xff] %v200_v33 }
  0xcf   :  { %v233_v34 = vpop.trf.xlu1  ;;  %v201_v35 = vpop.trf.xlu0 }
  0xd0   :  { %266 = vst [vmem:[#allocation5 + $0x188] sm:$0xff] %v233_v34  ;;  %250 = vst [vmem:[#allocation5 + $0x108] sm:$0xff] %v201_v35 }
  0xd3   :  { %v234_v36 = vpop.trf.xlu1  ;;  %v202_v37 = vpop.trf.xlu0 }
  0xd4   :  { %267 = vst [vmem:[#allocation5 + $0x190] sm:$0xff] %v234_v36  ;;  %251 = vst [vmem:[#allocation5 + $0x110] sm:$0xff] %v202_v37 }
  0xd7   :  { %v235_v38 = vpop.trf.xlu1  ;;  %v203_v39 = vpop.trf.xlu0 }
  0xd8   :  { %268 = vst [vmem:[#allocation5 + $0x198] sm:$0xff] %v235_v38  ;;  %252 = vst [vmem:[#allocation5 + $0x118] sm:$0xff] %v203_v39 }
  0xdb   :  { %v236_v40 = vpop.trf.xlu1  ;;  %v204_v41 = vpop.trf.xlu0 }
  0xdc   :  { %269 = vst [vmem:[#allocation5 + $0x1a0] sm:$0xff] %v236_v40  ;;  %253 = vst [vmem:[#allocation5 + $0x120] sm:$0xff] %v204_v41 }
  0xdf   :  { %v237_v42 = vpop.trf.xlu1  ;;  %v205_v43 = vpop.trf.xlu0 }
  0xe0   :  { %270 = vst [vmem:[#allocation5 + $0x1a8] sm:$0xff] %v237_v42  ;;  %254 = vst [vmem:[#allocation5 + $0x128] sm:$0xff] %v205_v43 }
  0xe3   :  { %v238_v44 = vpop.trf.xlu1  ;;  %v206_v45 = vpop.trf.xlu0 }
  0xe4   :  { %271 = vst [vmem:[#allocation5 + $0x1b0] sm:$0xff] %v238_v44  ;;  %255 = vst [vmem:[#allocation5 + $0x130] sm:$0xff] %v206_v45 }
  0xe7   :  { %v239_v46 = vpop.trf.xlu1  ;;  %v207_v47 = vpop.trf.xlu0 }
  0xe8   :  { %272 = vst [vmem:[#allocation5 + $0x1b8] sm:$0xff] %v239_v46  ;;  %256 = vst [vmem:[#allocation5 + $0x138] sm:$0xff] %v207_v47 }
  0xeb   :  { %v240_v48 = vpop.trf.xlu1  ;;  %v208_v49 = vpop.trf.xlu0 }
  0xec   :  { %273 = vst [vmem:[#allocation5 + $0x1c0] sm:$0xff] %v240_v48  ;;  %257 = vst [vmem:[#allocation5 + $0x140] sm:$0xff] %v208_v49 }
  0xef   :  { %v241_v50 = vpop.trf.xlu1  ;;  %v209_v51 = vpop.trf.xlu0 }
  0xf0   :  { %274 = vst [vmem:[#allocation5 + $0x1c8] sm:$0xff] %v241_v50  ;;  %258 = vst [vmem:[#allocation5 + $0x148] sm:$0xff] %v209_v51 }
  0xf3   :  { %v242_v52 = vpop.trf.xlu1  ;;  %v210_v53 = vpop.trf.xlu0 }
  0xf4   :  { %275 = vst [vmem:[#allocation5 + $0x1d0] sm:$0xff] %v242_v52  ;;  %259 = vst [vmem:[#allocation5 + $0x150] sm:$0xff] %v210_v53 }
  0xf7   :  { %v243_v54 = vpop.trf.xlu1  ;;  %v211_v55 = vpop.trf.xlu0 }
  0xf8   :  { %276 = vst [vmem:[#allocation5 + $0x1d8] sm:$0xff] %v243_v54  ;;  %260 = vst [vmem:[#allocation5 + $0x158] sm:$0xff] %v211_v55 }
  0xfb   :  { %v244_v56 = vpop.trf.xlu1  ;;  %v212_v57 = vpop.trf.xlu0 }
  0xfc   :  { %277 = vst [vmem:[#allocation5 + $0x1e0] sm:$0xff] %v244_v56  ;;  %261 = vst [vmem:[#allocation5 + $0x160] sm:$0xff] %v212_v57 }
  0xff   :  { %v245_v58 = vpop.trf.xlu1  ;;  %v213_v59 = vpop.trf.xlu0 }
 0x100   :  { %278 = vst [vmem:[#allocation5 + $0x1e8] sm:$0xff] %v245_v58  ;;  %262 = vst [vmem:[#allocation5 + $0x168] sm:$0xff] %v213_v59 }
 0x103   :  { %v246_v60 = vpop.trf.xlu1  ;;  %v214_v61 = vpop.trf.xlu0 }
 0x104   :  { %279 = vst [vmem:[#allocation5 + $0x1f0] sm:$0xff] %v246_v60  ;;  %263 = vst [vmem:[#allocation5 + $0x170] sm:$0xff] %v214_v61 }
 0x107   :  { %v247_v62 = vpop.trf.xlu1  ;;  %v215_v63 = vpop.trf.xlu0 }
 0x108   :  { %280 = vst [vmem:[#allocation5 + $0x1f8] sm:$0xff] %v247_v62  ;;  %264 = vst [vmem:[#allocation5 + $0x178] sm:$0xff] %v215_v63 }
 0x109   :  { %335 = shalt.err (!%p332_p9)
}
 0x10a   :  { %s352_s15 = smov 128   ;;  %s353_s16 = smov 8  }
 0x10b   :  { %292 = dma.vmem_to_hbm [thread:$0]  %s287_s13, 8192, %s371_s1, [#allocation4], %s352_s15, %s352_s15, %s353_s16  }
 0x10c   :  { %346 = dma.done.wait [#allocation4], 8192  }
 0x10d   :  { %347 = vsyncadd [#allocation4], 4294959104 }
 0x10e   :  { %296 = vsyncpa [#allocation3], 1 }
 0x10f   :  { %297 = vsyncpa [#allocation4], 1 }

</bundles_post_ra>
